<compile_context>
chip_gen: v5e
topology: v5e:2x2
jax: 0.10.0
libtpu: 0.0.40
codegen_flags: <defaults>
</compile_context>

<pallas_src>
import math

import jax
import jax.numpy as jnp
from jax import lax
from jax.experimental import pallas as pl
from jax.experimental.pallas import tpu as pltpu


# ---------------------------------------------------------------------------
# Hoisted projections: simple rows-parallel matmul (weights resident in VMEM).
# ---------------------------------------------------------------------------
def _proj_kernel(a_ref, b_ref, o_ref):
    o_ref[...] = jnp.dot(a_ref[...], b_ref[...],
                         preferred_element_type=jnp.float32).astype(o_ref.dtype)


def _row_tile(m, pref=256):
    if m <= pref:
        return m
    for t in range(pref, 7, -1):
        if m % t == 0 and t % 8 == 0:
            return t
    return m


def _project(a, b):
    """a @ b, a:(M,K), b:(K,N).  K and N kept whole (small weights stay resident)."""
    M, K = a.shape
    K2, N = b.shape
    assert K == K2
    tm = _row_tile(M)
    return pl.pallas_call(
        _proj_kernel,
        grid=(M // tm,),
        in_specs=[
            pl.BlockSpec((tm, K), lambda i: (i, 0)),   # rows streamed per step
            pl.BlockSpec((K, N), lambda i: (0, 0)),    # weights: fetched once, resident
        ],
        out_specs=pl.BlockSpec((tm, N), lambda i: (i, 0)),
        out_shape=jax.ShapeDtypeStruct((M, N), jnp.float32),
        compiler_params=pltpu.CompilerParams(
            # Rows are independent -> parallel (feeds v7x's 2nd TensorCore).
            dimension_semantics=("parallel",),
        ),
        cost_estimate=pl.CostEstimate(
            flops=2 * M * K * N, transcendentals=0,
            bytes_accessed=4 * (M * K + K * N + M * N)),
    )(a, b)


# ---------------------------------------------------------------------------
# Serial recurrence: h_t = tanh(xU_t + h_{t-1} @ V^T), emitting the h history.
# ---------------------------------------------------------------------------
def _recurrence_kernel(h0_ref, xu_ref, vt_ref, hseq_ref, hlast_ref):
    t = pl.program_id(0)

    @pl.when(t == 0)
    def _():
        hlast_ref[...] = h0_ref[...]          # seed the resident carry

    vt = vt_ref[...]                          # (H, H) f32, resident in VMEM
    tc = xu_ref.shape[0]                      # time steps in this chunk

    def step(i, h):
        h_new = jnp.tanh(xu_ref[i] +
                         jnp.dot(h, vt, preferred_element_type=jnp.float32))
        hseq_ref[i] = h_new
        return h_new

    # Fully unrolled: LLO can overlap step i's store with step i+1's matmul.
    hlast_ref[...] = lax.fori_loop(0, tc, step, hlast_ref[...], unroll=True)


def _pick_time_chunk(T, max_chunk=32):
    for c in range(min(T, max_chunk), 0, -1):
        if T % c == 0:
            return c
    return 1


def _recurrence(xu, h0, vt):
    T, B, H = xu.shape
    tc = _pick_time_chunk(T)                  # T=8 -> tc=8 -> grid=(1,)
    return pl.pallas_call(
        _recurrence_kernel,
        grid=(T // tc,),
        in_specs=[
            pl.BlockSpec((B, H), lambda t: (0, 0)),         # h0 (read at t==0)
            pl.BlockSpec((tc, B, H), lambda t: (t, 0, 0)),  # xU chunk streamed in
            pl.BlockSpec((H, H), lambda t: (0, 0)),         # V^T resident (f32)
        ],
        out_specs=[
            pl.BlockSpec((tc, B, H), lambda t: (t, 0, 0)),  # h history streamed out
            pl.BlockSpec((B, H), lambda t: (0, 0)),         # resident carry / h_last
        ],
        out_shape=(
            jax.ShapeDtypeStruct((T, B, H), jnp.float32),
            jax.ShapeDtypeStruct((B, H), jnp.float32),
        ),
        compiler_params=pltpu.CompilerParams(
            # The time axis is a true recurrence -> sequential ("arbitrary").
            dimension_semantics=("arbitrary",),
        ),
        cost_estimate=pl.CostEstimate(
            flops=2 * T * B * H * H,
            transcendentals=T * B * H,
            bytes_accessed=4 * (2 * T * B * H + H * H + 2 * B * H)),
    )(h0, xu, vt)


# ---------------------------------------------------------------------------
# Public API
# ---------------------------------------------------------------------------
@jax.jit
def basic_rnn_rollout(xs, h0, U, V, W):
    """Run BasicRNN.forward over a whole sequence.

    Args:
      xs: (T, B, I) inputs (one per module.forward call).
      h0: (B, H) initial hidden state (zeros after reset_hidden_state).
      U:  (H, I), V: (H, H), W: (O, H)  -- PyTorch parameter layouts.

    Returns:
      ys:     (T, B, O) outputs.
      h_last: (B, H) final hidden state.
    """
    T, B, I = xs.shape
    H, O = V.shape[0], W.shape[0]
    xs32 = xs.astype(jnp.float32)
    # (1) hoisted, time-independent input projection: full MXU row utilization.
    xu = _project(xs32.reshape(T * B, I), U.T.astype(jnp.float32)).reshape(T, B, H)
    # (2) irreducible serial part.
    h_seq, h_last = _recurrence(xu, h0.astype(jnp.float32), V.T.astype(jnp.float32))
    # (3) hoisted output projection.
    ys = _project(h_seq.reshape(T * B, H), W.T.astype(jnp.float32)).reshape(T, B, O)
    return ys, h_last


def basic_rnn_step(x, h, U, V, W):
    """Single-step API matching module.forward(x): returns (h_new, y)."""
    ys, h_last = basic_rnn_rollout(x[None], h, U, V, W)
    return h_last, ys[0]


if __name__ == "__main__":
    key = jax.random.PRNGKey(0)
    kx, ku, kv, kw = jax.random.split(key, 4)

    # Small shapes consistent with the module defaults (hstate = output = 128).
    T, B, I, H, O = 8, 8, 128, 128, 128
    # TODO(synk): at B=8 only 8 of 128/256 MXU rows are active in the recurrence;
    # batching more independent sequences (B>=16, ideally 128) raises MXU/VPU
    # utilization and would let a parallel batch axis feed v7x's 2nd TensorCore.

    xs = jax.random.normal(kx, (T, B, I), jnp.float32)
    # PyTorch init: uniform(-1/sqrt(fan_in), +1/sqrt(fan_in)).
    U = jax.random.uniform(ku, (H, I), jnp.float32, -1 / math.sqrt(I), 1 / math.sqrt(I))
    V = jax.random.uniform(kv, (H, H), jnp.float32, -1 / math.sqrt(H), 1 / math.sqrt(H))
    W = jax.random.uniform(kw, (O, H), jnp.float32, -1 / math.sqrt(H), 1 / math.sqrt(H))
    h0 = jnp.zeros((B, H), jnp.float32)        # reset_hidden_state

    ys, h_last = basic_rnn_rollout(xs, h0, U, V, W)
    jax.block_until_ready((ys, h_last))

    # Pure-JAX f32 reference with PyTorch semantics.
    h = h0
    ref = []
    for t in range(T):
        h = jnp.tanh(xs[t] @ U.T + h @ V.T)
        ref.append(h @ W.T)
    ref = jnp.stack(ref)
    assert jnp.allclose(ys, ref, atol=5e-2, rtol=5e-2), float(jnp.max(jnp.abs(ys - ref)))
    assert jnp.allclose(h_last, h, atol=5e-2, rtol=5e-2)

    # Single-step API (== one module.forward call) still works.
    h1, y1 = basic_rnn_step(xs[0], h0, U, V, W)
    jax.block_until_ready((h1, y1))
    assert jnp.allclose(y1, ref[0], atol=5e-2, rtol=5e-2)

    print("KERNEL_OK")
</pallas_src>

<mosaic_0001>
module attributes {stable_mosaic.version = 11 : i64} {
  func.func @_recurrence_kernel(%arg0: i32, %arg1: memref<8x128xf32, #tpu.memory_space<vmem>>, %arg2: memref<8x8x128xf32, #tpu.memory_space<vmem>>, %arg3: memref<128x128xf32, #tpu.memory_space<vmem>>, %arg4: memref<8x8x128xf32, #tpu.memory_space<vmem>>, %arg5: memref<8x128xf32, #tpu.memory_space<vmem>>) attributes {dimension_semantics = [#tpu.dimension_semantics<arbitrary>], iteration_bounds = array<i64: 1>, scalar_prefetch = 0 : i64, scratch_operands = 0 : i64, tpu.core_type = #tpu.core_type<tc>, window_params = [{pipeline_mode = #tpu.pipeline_mode<synchronous>, transform_indices = @transform_0, window_bounds = array<i64: 8, 128>}, {transform_indices = @transform_1, window_bounds = array<i64: 8, 8, 128>}, {pipeline_mode = #tpu.pipeline_mode<synchronous>, transform_indices = @transform_2, window_bounds = array<i64: 128, 128>}, {transform_indices = @transform_3, window_bounds = array<i64: 8, 8, 128>}, {pipeline_mode = #tpu.pipeline_mode<synchronous>, transform_indices = @transform_4, window_bounds = array<i64: 8, 128>}]} {
    %c0_i32 = arith.constant 0 : i32
    %0 = arith.cmpi eq, %arg0, %c0_i32 : i32
    %1 = arith.extui %0 : i1 to i32
    %c0_i32_0 = arith.constant 0 : i32
    %2 = arith.cmpi ne, %1, %c0_i32_0 : i32
    scf.if %2 {
      %c0_46 = arith.constant 0 : index
      %c0_47 = arith.constant 0 : index
      %86 = vector.load %arg1[%c0_46, %c0_47] : memref<8x128xf32, #tpu.memory_space<vmem>>, vector<8x128xf32>
      %c0_48 = arith.constant 0 : index
      %c0_49 = arith.constant 0 : index
      %87 = vector.load %arg5[%c0_48, %c0_49] : memref<8x128xf32, #tpu.memory_space<vmem>>, vector<8x128xf32>
      tpu.vector_store %arg5[%c0_48, %c0_49], %86 {strides = array<i32>} : memref<8x128xf32, #tpu.memory_space<vmem>>, vector<8x128xf32>,
    } else {
    }
    %c0 = arith.constant 0 : index
    %c0_1 = arith.constant 0 : index
    %3 = vector.load %arg3[%c0, %c0_1] : memref<128x128xf32, #tpu.memory_space<vmem>>, vector<128x128xf32>
    %c0_2 = arith.constant 0 : index
    %c0_3 = arith.constant 0 : index
    %4 = vector.load %arg5[%c0_2, %c0_3] : memref<8x128xf32, #tpu.memory_space<vmem>>, vector<8x128xf32>
    %c0_i32_4 = arith.constant 0 : i32
    %5 = arith.index_cast %c0_i32_4 : i32 to index
    %c0_5 = arith.constant 0 : index
    %c0_6 = arith.constant 0 : index
    %6 = vector.load %arg2[%5, %c0_5, %c0_6] : memref<8x8x128xf32, #tpu.memory_space<vmem>>, vector<1x8x128xf32>
    %7 = vector.shape_cast %6 : vector<1x8x128xf32> to vector<8x128xf32>
    %cst = arith.constant dense<0.000000e+00> : vector<8x128xf32>
    %8 = tpu.matmul %4, %3, %cst {dimension_numbers = #tpu.dot_dimension_numbers<[1], [0], [0], [1], [0, 0, 1, 1], [], []>} : vector<8x128xf32>, vector<128x128xf32>, vector<8x128xf32> -> vector<8x128xf32>
    %9 = arith.addf %7, %8 : vector<8x128xf32>
    %10 = math.tanh %9 : vector<8x128xf32>
    %11 = arith.index_cast %c0_i32_4 : i32 to index
    %c0_7 = arith.constant 0 : index
    %c0_8 = arith.constant 0 : index
    %12 = vector.load %arg4[%11, %c0_7, %c0_8] : memref<8x8x128xf32, #tpu.memory_space<vmem>>, vector<1x8x128xf32>
    %13 = vector.shape_cast %12 : vector<1x8x128xf32> to vector<8x128xf32>
    %14 = vector.shape_cast %10 : vector<8x128xf32> to vector<1x8x128xf32>
    tpu.vector_store %arg4[%11, %c0_7, %c0_8], %14 {strides = array<i32>} : memref<8x8x128xf32, #tpu.memory_space<vmem>>, vector<1x8x128xf32>,
    %c1_i32 = arith.constant 1 : i32
    %15 = arith.index_cast %c1_i32 : i32 to index
    %c0_9 = arith.constant 0 : index
    %c0_10 = arith.constant 0 : index
    %16 = vector.load %arg2[%15, %c0_9, %c0_10] : memref<8x8x128xf32, #tpu.memory_space<vmem>>, vector<1x8x128xf32>
    %17 = vector.shape_cast %16 : vector<1x8x128xf32> to vector<8x128xf32>
    %cst_11 = arith.constant dense<0.000000e+00> : vector<8x128xf32>
    %18 = tpu.matmul %10, %3, %cst_11 {dimension_numbers = #tpu.dot_dimension_numbers<[1], [0], [0], [1], [0, 0, 1, 1], [], []>} : vector<8x128xf32>, vector<128x128xf32>, vector<8x128xf32> -> vector<8x128xf32>
    %19 = arith.addf %17, %18 : vector<8x128xf32>
    %20 = math.tanh %19 : vector<8x128xf32>
    %21 = arith.index_cast %c1_i32 : i32 to index
    %c0_12 = arith.constant 0 : index
    %c0_13 = arith.constant 0 : index
    %22 = vector.load %arg4[%21, %c0_12, %c0_13] : memref<8x8x128xf32, #tpu.memory_space<vmem>>, vector<1x8x128xf32>
    %23 = vector.shape_cast %22 : vector<1x8x128xf32> to vector<8x128xf32>
    %24 = vector.shape_cast %20 : vector<8x128xf32> to vector<1x8x128xf32>
    tpu.vector_store %arg4[%21, %c0_12, %c0_13], %24 {strides = array<i32>} : memref<8x8x128xf32, #tpu.memory_space<vmem>>, vector<1x8x128xf32>,
    %c2_i32 = arith.constant 2 : i32
    %25 = arith.index_cast %c2_i32 : i32 to index
    %c0_14 = arith.constant 0 : index
    %c0_15 = arith.constant 0 : index
    %26 = vector.load %arg2[%25, %c0_14, %c0_15] : memref<8x8x128xf32, #tpu.memory_space<vmem>>, vector<1x8x128xf32>
    %27 = vector.shape_cast %26 : vector<1x8x128xf32> to vector<8x128xf32>
    %cst_16 = arith.constant dense<0.000000e+00> : vector<8x128xf32>
    %28 = tpu.matmul %20, %3, %cst_16 {dimension_numbers = #tpu.dot_dimension_numbers<[1], [0], [0], [1], [0, 0, 1, 1], [], []>} : vector<8x128xf32>, vector<128x128xf32>, vector<8x128xf32> -> vector<8x128xf32>
    %29 = arith.addf %27, %28 : vector<8x128xf32>
    %30 = math.tanh %29 : vector<8x128xf32>
    %31 = arith.index_cast %c2_i32 : i32 to index
    %c0_17 = arith.constant 0 : index
    %c0_18 = arith.constant 0 : index
    %32 = vector.load %arg4[%31, %c0_17, %c0_18] : memref<8x8x128xf32, #tpu.memory_space<vmem>>, vector<1x8x128xf32>
    %33 = vector.shape_cast %32 : vector<1x8x128xf32> to vector<8x128xf32>
    %34 = vector.shape_cast %30 : vector<8x128xf32> to vector<1x8x128xf32>
    tpu.vector_store %arg4[%31, %c0_17, %c0_18], %34 {strides = array<i32>} : memref<8x8x128xf32, #tpu.memory_space<vmem>>, vector<1x8x128xf32>,
    %c3_i32 = arith.constant 3 : i32
    %35 = arith.index_cast %c3_i32 : i32 to index
    %c0_19 = arith.constant 0 : index
    %c0_20 = arith.constant 0 : index
    %36 = vector.load %arg2[%35, %c0_19, %c0_20] : memref<8x8x128xf32, #tpu.memory_space<vmem>>, vector<1x8x128xf32>
    %37 = vector.shape_cast %36 : vector<1x8x128xf32> to vector<8x128xf32>
    %cst_21 = arith.constant dense<0.000000e+00> : vector<8x128xf32>
    %38 = tpu.matmul %30, %3, %cst_21 {dimension_numbers = #tpu.dot_dimension_numbers<[1], [0], [0], [1], [0, 0, 1, 1], [], []>} : vector<8x128xf32>, vector<128x128xf32>, vector<8x128xf32> -> vector<8x128xf32>
    %39 = arith.addf %37, %38 : vector<8x128xf32>
    %40 = math.tanh %39 : vector<8x128xf32>
    %41 = arith.index_cast %c3_i32 : i32 to index
    %c0_22 = arith.constant 0 : index
    %c0_23 = arith.constant 0 : index
    %42 = vector.load %arg4[%41, %c0_22, %c0_23] : memref<8x8x128xf32, #tpu.memory_space<vmem>>, vector<1x8x128xf32>
    %43 = vector.shape_cast %42 : vector<1x8x128xf32> to vector<8x128xf32>
    %44 = vector.shape_cast %40 : vector<8x128xf32> to vector<1x8x128xf32>
    tpu.vector_store %arg4[%41, %c0_22, %c0_23], %44 {strides = array<i32>} : memref<8x8x128xf32, #tpu.memory_space<vmem>>, vector<1x8x128xf32>,
    %c4_i32 = arith.constant 4 : i32
    %45 = arith.index_cast %c4_i32 : i32 to index
    %c0_24 = arith.constant 0 : index
    %c0_25 = arith.constant 0 : index
    %46 = vector.load %arg2[%45, %c0_24, %c0_25] : memref<8x8x128xf32, #tpu.memory_space<vmem>>, vector<1x8x128xf32>
    %47 = vector.shape_cast %46 : vector<1x8x128xf32> to vector<8x128xf32>
    %cst_26 = arith.constant dense<0.000000e+00> : vector<8x128xf32>
    %48 = tpu.matmul %40, %3, %cst_26 {dimension_numbers = #tpu.dot_dimension_numbers<[1], [0], [0], [1], [0, 0, 1, 1], [], []>} : vector<8x128xf32>, vector<128x128xf32>, vector<8x128xf32> -> vector<8x128xf32>
    %49 = arith.addf %47, %48 : vector<8x128xf32>
    %50 = math.tanh %49 : vector<8x128xf32>
    %51 = arith.index_cast %c4_i32 : i32 to index
    %c0_27 = arith.constant 0 : index
    %c0_28 = arith.constant 0 : index
    %52 = vector.load %arg4[%51, %c0_27, %c0_28] : memref<8x8x128xf32, #tpu.memory_space<vmem>>, vector<1x8x128xf32>
    %53 = vector.shape_cast %52 : vector<1x8x128xf32> to vector<8x128xf32>
    %54 = vector.shape_cast %50 : vector<8x128xf32> to vector<1x8x128xf32>
    tpu.vector_store %arg4[%51, %c0_27, %c0_28], %54 {strides = array<i32>} : memref<8x8x128xf32, #tpu.memory_space<vmem>>, vector<1x8x128xf32>,
    %c5_i32 = arith.constant 5 : i32
    %55 = arith.index_cast %c5_i32 : i32 to index
    %c0_29 = arith.constant 0 : index
    %c0_30 = arith.constant 0 : index
    %56 = vector.load %arg2[%55, %c0_29, %c0_30] : memref<8x8x128xf32, #tpu.memory_space<vmem>>, vector<1x8x128xf32>
    %57 = vector.shape_cast %56 : vector<1x8x128xf32> to vector<8x128xf32>
    %cst_31 = arith.constant dense<0.000000e+00> : vector<8x128xf32>
    %58 = tpu.matmul %50, %3, %cst_31 {dimension_numbers = #tpu.dot_dimension_numbers<[1], [0], [0], [1], [0, 0, 1, 1], [], []>} : vector<8x128xf32>, vector<128x128xf32>, vector<8x128xf32> -> vector<8x128xf32>
    %59 = arith.addf %57, %58 : vector<8x128xf32>
    %60 = math.tanh %59 : vector<8x128xf32>
    %61 = arith.index_cast %c5_i32 : i32 to index
    %c0_32 = arith.constant 0 : index
    %c0_33 = arith.constant 0 : index
    %62 = vector.load %arg4[%61, %c0_32, %c0_33] : memref<8x8x128xf32, #tpu.memory_space<vmem>>, vector<1x8x128xf32>
    %63 = vector.shape_cast %62 : vector<1x8x128xf32> to vector<8x128xf32>
    %64 = vector.shape_cast %60 : vector<8x128xf32> to vector<1x8x128xf32>
    tpu.vector_store %arg4[%61, %c0_32, %c0_33], %64 {strides = array<i32>} : memref<8x8x128xf32, #tpu.memory_space<vmem>>, vector<1x8x128xf32>,
    %c6_i32 = arith.constant 6 : i32
    %65 = arith.index_cast %c6_i32 : i32 to index
    %c0_34 = arith.constant 0 : index
    %c0_35 = arith.constant 0 : index
    %66 = vector.load %arg2[%65, %c0_34, %c0_35] : memref<8x8x128xf32, #tpu.memory_space<vmem>>, vector<1x8x128xf32>
    %67 = vector.shape_cast %66 : vector<1x8x128xf32> to vector<8x128xf32>
    %cst_36 = arith.constant dense<0.000000e+00> : vector<8x128xf32>
    %68 = tpu.matmul %60, %3, %cst_36 {dimension_numbers = #tpu.dot_dimension_numbers<[1], [0], [0], [1], [0, 0, 1, 1], [], []>} : vector<8x128xf32>, vector<128x128xf32>, vector<8x128xf32> -> vector<8x128xf32>
    %69 = arith.addf %67, %68 : vector<8x128xf32>
    %70 = math.tanh %69 : vector<8x128xf32>
    %71 = arith.index_cast %c6_i32 : i32 to index
    %c0_37 = arith.constant 0 : index
    %c0_38 = arith.constant 0 : index
    %72 = vector.load %arg4[%71, %c0_37, %c0_38] : memref<8x8x128xf32, #tpu.memory_space<vmem>>, vector<1x8x128xf32>
    %73 = vector.shape_cast %72 : vector<1x8x128xf32> to vector<8x128xf32>
    %74 = vector.shape_cast %70 : vector<8x128xf32> to vector<1x8x128xf32>
    tpu.vector_store %arg4[%71, %c0_37, %c0_38], %74 {strides = array<i32>} : memref<8x8x128xf32, #tpu.memory_space<vmem>>, vector<1x8x128xf32>,
    %c7_i32 = arith.constant 7 : i32
    %75 = arith.index_cast %c7_i32 : i32 to index
    %c0_39 = arith.constant 0 : index
    %c0_40 = arith.constant 0 : index
    %76 = vector.load %arg2[%75, %c0_39, %c0_40] : memref<8x8x128xf32, #tpu.memory_space<vmem>>, vector<1x8x128xf32>
    %77 = vector.shape_cast %76 : vector<1x8x128xf32> to vector<8x128xf32>
    %cst_41 = arith.constant dense<0.000000e+00> : vector<8x128xf32>
    %78 = tpu.matmul %70, %3, %cst_41 {dimension_numbers = #tpu.dot_dimension_numbers<[1], [0], [0], [1], [0, 0, 1, 1], [], []>} : vector<8x128xf32>, vector<128x128xf32>, vector<8x128xf32> -> vector<8x128xf32>
    %79 = arith.addf %77, %78 : vector<8x128xf32>
    %80 = math.tanh %79 : vector<8x128xf32>
    %81 = arith.index_cast %c7_i32 : i32 to index
    %c0_42 = arith.constant 0 : index
    %c0_43 = arith.constant 0 : index
    %82 = vector.load %arg4[%81, %c0_42, %c0_43] : memref<8x8x128xf32, #tpu.memory_space<vmem>>, vector<1x8x128xf32>
    %83 = vector.shape_cast %82 : vector<1x8x128xf32> to vector<8x128xf32>
    %84 = vector.shape_cast %80 : vector<8x128xf32> to vector<1x8x128xf32>
    tpu.vector_store %arg4[%81, %c0_42, %c0_43], %84 {strides = array<i32>} : memref<8x8x128xf32, #tpu.memory_space<vmem>>, vector<1x8x128xf32>,
    %c8_i32 = arith.constant 8 : i32
    %c0_44 = arith.constant 0 : index
    %c0_45 = arith.constant 0 : index
    %85 = vector.load %arg5[%c0_44, %c0_45] : memref<8x128xf32, #tpu.memory_space<vmem>>, vector<8x128xf32>
    tpu.vector_store %arg5[%c0_44, %c0_45], %80 {strides = array<i32>} : memref<8x128xf32, #tpu.memory_space<vmem>>, vector<8x128xf32>,
    return
  }
  func.func @transform_0(%arg0: i32) -> (i32, i32) {
    %c0_i32 = arith.constant 0 : i32
    %c0_i32_0 = arith.constant 0 : i32
    %c0_i32_1 = arith.constant 0 : i32
    return %c0_i32, %c0_i32_0 : i32, i32
  }
  func.func @transform_1(%arg0: i32) -> (i32, i32, i32) {
    %c0_i32 = arith.constant 0 : i32
    %c0_i32_0 = arith.constant 0 : i32
    %c0_i32_1 = arith.constant 0 : i32
    return %arg0, %c0_i32, %c0_i32_0 : i32, i32, i32
  }
  func.func @transform_2(%arg0: i32) -> (i32, i32) {
    %c0_i32 = arith.constant 0 : i32
    %c0_i32_0 = arith.constant 0 : i32
    %c0_i32_1 = arith.constant 0 : i32
    return %c0_i32, %c0_i32_0 : i32, i32
  }
  func.func @transform_3(%arg0: i32) -> (i32, i32, i32) {
    %c0_i32 = arith.constant 0 : i32
    %c0_i32_0 = arith.constant 0 : i32
    %c0_i32_1 = arith.constant 0 : i32
    return %arg0, %c0_i32, %c0_i32_0 : i32, i32, i32
  }
  func.func @transform_4(%arg0: i32) -> (i32, i32) {
    %c0_i32 = arith.constant 0 : i32
    %c0_i32_0 = arith.constant 0 : i32
    %c0_i32_1 = arith.constant 0 : i32
    return %c0_i32, %c0_i32_0 : i32, i32
  }
}

module attributes {stable_mosaic.version = 11 : i64} {
  func.func @_proj_kernel(%arg0: i32, %arg1: memref<64x128xf32, #tpu.memory_space<vmem>>, %arg2: memref<128x128xf32, #tpu.memory_space<vmem>>, %arg3: memref<64x128xf32, #tpu.memory_space<vmem>>) attributes {dimension_semantics = [#tpu.dimension_semantics<parallel>], iteration_bounds = array<i64: 1>, scalar_prefetch = 0 : i64, scratch_operands = 0 : i64, tpu.core_type = #tpu.core_type<tc>, window_params = [{transform_indices = @transform_0, window_bounds = array<i64: 64, 128>}, {pipeline_mode = #tpu.pipeline_mode<synchronous>, transform_indices = @transform_1, window_bounds = array<i64: 128, 128>}, {transform_indices = @transform_2, window_bounds = array<i64: 64, 128>}]} {
    %c0 = arith.constant 0 : index
    %c0_0 = arith.constant 0 : index
    %0 = vector.load %arg1[%c0, %c0_0] : memref<64x128xf32, #tpu.memory_space<vmem>>, vector<64x128xf32>
    %c0_1 = arith.constant 0 : index
    %c0_2 = arith.constant 0 : index
    %1 = vector.load %arg2[%c0_1, %c0_2] : memref<128x128xf32, #tpu.memory_space<vmem>>, vector<128x128xf32>
    %cst = arith.constant dense<0.000000e+00> : vector<64x128xf32>
    %2 = tpu.matmul %0, %1, %cst {dimension_numbers = #tpu.dot_dimension_numbers<[1], [0], [0], [1], [0, 0, 1, 1], [], []>} : vector<64x128xf32>, vector<128x128xf32>, vector<64x128xf32> -> vector<64x128xf32>
    %c0_3 = arith.constant 0 : index
    %c0_4 = arith.constant 0 : index
    %3 = vector.load %arg3[%c0_3, %c0_4] : memref<64x128xf32, #tpu.memory_space<vmem>>, vector<64x128xf32>
    tpu.vector_store %arg3[%c0_3, %c0_4], %2 {strides = array<i32>} : memref<64x128xf32, #tpu.memory_space<vmem>>, vector<64x128xf32>,
    return
  }
  func.func @transform_0(%arg0: i32) -> (i32, i32) {
    %c0_i32 = arith.constant 0 : i32
    %c0_i32_0 = arith.constant 0 : i32
    return %arg0, %c0_i32 : i32, i32
  }
  func.func @transform_1(%arg0: i32) -> (i32, i32) {
    %c0_i32 = arith.constant 0 : i32
    %c0_i32_0 = arith.constant 0 : i32
    %c0_i32_1 = arith.constant 0 : i32
    return %c0_i32, %c0_i32_0 : i32, i32
  }
  func.func @transform_2(%arg0: i32) -> (i32, i32) {
    %c0_i32 = arith.constant 0 : i32
    %c0_i32_0 = arith.constant 0 : i32
    return %arg0, %c0_i32 : i32, i32
  }
}

module attributes {stable_mosaic.version = 11 : i64} {
  func.func @_proj_kernel(%arg0: i32, %arg1: memref<64x128xf32, #tpu.memory_space<vmem>>, %arg2: memref<128x128xf32, #tpu.memory_space<vmem>>, %arg3: memref<64x128xf32, #tpu.memory_space<vmem>>) attributes {dimension_semantics = [#tpu.dimension_semantics<parallel>], iteration_bounds = array<i64: 1>, scalar_prefetch = 0 : i64, scratch_operands = 0 : i64, tpu.core_type = #tpu.core_type<tc>, window_params = [{transform_indices = @transform_0, window_bounds = array<i64: 64, 128>}, {pipeline_mode = #tpu.pipeline_mode<synchronous>, transform_indices = @transform_1, window_bounds = array<i64: 128, 128>}, {transform_indices = @transform_2, window_bounds = array<i64: 64, 128>}]} {
    %c0 = arith.constant 0 : index
    %c0_0 = arith.constant 0 : index
    %0 = vector.load %arg1[%c0, %c0_0] : memref<64x128xf32, #tpu.memory_space<vmem>>, vector<64x128xf32>
    %c0_1 = arith.constant 0 : index
    %c0_2 = arith.constant 0 : index
    %1 = vector.load %arg2[%c0_1, %c0_2] : memref<128x128xf32, #tpu.memory_space<vmem>>, vector<128x128xf32>
    %cst = arith.constant dense<0.000000e+00> : vector<64x128xf32>
    %2 = tpu.matmul %0, %1, %cst {dimension_numbers = #tpu.dot_dimension_numbers<[1], [0], [0], [1], [0, 0, 1, 1], [], []>} : vector<64x128xf32>, vector<128x128xf32>, vector<64x128xf32> -> vector<64x128xf32>
    %c0_3 = arith.constant 0 : index
    %c0_4 = arith.constant 0 : index
    %3 = vector.load %arg3[%c0_3, %c0_4] : memref<64x128xf32, #tpu.memory_space<vmem>>, vector<64x128xf32>
    tpu.vector_store %arg3[%c0_3, %c0_4], %2 {strides = array<i32>} : memref<64x128xf32, #tpu.memory_space<vmem>>, vector<64x128xf32>,
    return
  }
  func.func @transform_0(%arg0: i32) -> (i32, i32) {
    %c0_i32 = arith.constant 0 : i32
    %c0_i32_0 = arith.constant 0 : i32
    return %arg0, %c0_i32 : i32, i32
  }
  func.func @transform_1(%arg0: i32) -> (i32, i32) {
    %c0_i32 = arith.constant 0 : i32
    %c0_i32_0 = arith.constant 0 : i32
    %c0_i32_1 = arith.constant 0 : i32
    return %c0_i32, %c0_i32_0 : i32, i32
  }
  func.func @transform_2(%arg0: i32) -> (i32, i32) {
    %c0_i32 = arith.constant 0 : i32
    %c0_i32_0 = arith.constant 0 : i32
    return %arg0, %c0_i32 : i32, i32
  }
}

</mosaic_0001>

<bundles_post_ra>
// kernel: basic_rnn_rollout.3
= control target key start
LH: loop header
LB: loop body
LE: loop exit
PB: predicated region body
PF: predicated region fallthrough
CT: control target
= control target key end

     0   :  { %s247_s1 = inlined_call_operand.vmem [shape: f32[128,128], index: 1, kind: input, shape index: {}]   ;;  %s248_s0 = inlined_call_operand.vmem [shape: f32[64,128], index: 0, kind: input, shape index: {}]   ;;  %s249_s2 = inlined_call_operand.vmem [shape: f32[64,128], index: 2, kind: output, shape index: {}]  }
   0x1   :  { %v34_v0 = vld [vmem:[%s247_s1 + $0x78] sm:$0xff]  ;;  %v33_v1 = vld [vmem:[%s247_s1 + $0x70] sm:$0xff]  ;;  %v32_v2 = vld [vmem:[%s247_s1 + $0x68] sm:$0xff] }
   0x2   :  { %89 = vmatpush.msra.mxu2 %v34_v0  ;;  %90 = vmatpush.msra.mxu3 %v34_v0  ;;  %v31_v3 = vld [vmem:[%s247_s1 + $0x60] sm:$0xff]  ;;  %v30_v4 = vld [vmem:[%s247_s1 + $0x58] sm:$0xff]  ;;  %v29_v5 = vld [vmem:[%s247_s1 + $0x50] sm:$0xff] }
   0x3   :  { %35 = vmatpush.msra.mxu0 %v34_v0  ;;  %88 = vmatpush.msra.mxu1 %v34_v0  ;;  %v28_v6 = vld [vmem:[%s247_s1 + $0x48] sm:$0xff]  ;;  %v27_v7 = vld [vmem:[%s247_s1 + $0x40] sm:$0xff]  ;;  %v26_v8 = vld [vmem:[%s247_s1 + $0x38] sm:$0xff] }
   0x4   :  { %92 = vmatpush.msra.mxu2 %v33_v1  ;;  %93 = vmatpush.msra.mxu3 %v33_v1  ;;  %v25_v9 = vld [vmem:[%s247_s1 + $0x30] sm:$0xff]  ;;  %v24_v10 = vld [vmem:[%s247_s1 + $0x28] sm:$0xff]  ;;  %v23_v11 = vld [vmem:[%s247_s1 + $0x20] sm:$0xff] }
   0x5   :  { %36 = vmatpush.msra.mxu0 %v33_v1  ;;  %91 = vmatpush.msra.mxu1 %v33_v1  ;;  %v22_v12 = vld [vmem:[%s247_s1 + $0x18] sm:$0xff]  ;;  %v21_v13 = vld [vmem:[%s247_s1 + $0x10] sm:$0xff]  ;;  %v20_v14 = vld [vmem:[%s247_s1 + $0x8] sm:$0xff] }
   0x6   :  { %95 = vmatpush.msra.mxu2 %v32_v2  ;;  %96 = vmatpush.msra.mxu3 %v32_v2  ;;  %v19_v15 = vld [vmem:[%s247_s1] sm:$0xff]  ;;  %v17_v17 = vld [vmem:[%s248_s0 + $0x30] sm:$0xff]  ;;  %v16_v20 = vld [vmem:[%s248_s0 + $0x28] sm:$0xff] }
   0x7   :  { %37 = vmatpush.msra.mxu0 %v32_v2  ;;  %94 = vmatpush.msra.mxu1 %v32_v2  ;;  %v15_v16 = vld [vmem:[%s248_s0 + $0x20] sm:$0xff]  ;;  %v13_v19 = vld [vmem:[%s248_s0 + $0x10] sm:$0xff]  ;;  %v18_v21 = vld [vmem:[%s248_s0 + $0x38] sm:$0xff] }
   0x8   :  { %98 = vmatpush.msra.mxu2 %v31_v3  ;;  %99 = vmatpush.msra.mxu3 %v31_v3  ;;  %v11_v18 = vld [vmem:[%s248_s0] sm:$0xff]  ;;  %v12_v22 = vld [vmem:[%s248_s0 + $0x8] sm:$0xff]  ;;  %v14_v23 = vld [vmem:[%s248_s0 + $0x18] sm:$0xff] }
   0x9   :  { %38 = vmatpush.msra.mxu0 %v31_v3  ;;  %97 = vmatpush.msra.mxu1 %v31_v3 }
   0xa   :  { %101 = vmatpush.msra.mxu2 %v30_v4  ;;  %102 = vmatpush.msra.mxu3 %v30_v4 }
   0xb   :  { %39 = vmatpush.msra.mxu0 %v30_v4  ;;  %100 = vmatpush.msra.mxu1 %v30_v4 }
   0xc   :  { %104 = vmatpush.msra.mxu2 %v29_v5  ;;  %105 = vmatpush.msra.mxu3 %v29_v5 }
   0xd   :  { %40 = vmatpush.msra.mxu0 %v29_v5  ;;  %103 = vmatpush.msra.mxu1 %v29_v5 }
   0xe   :  { %107 = vmatpush.msra.mxu2 %v28_v6  ;;  %108 = vmatpush.msra.mxu3 %v28_v6 }
   0xf   :  { %41 = vmatpush.msra.mxu0 %v28_v6  ;;  %106 = vmatpush.msra.mxu1 %v28_v6 }
  0x10   :  { %110 = vmatpush.msra.mxu2 %v27_v7  ;;  %111 = vmatpush.msra.mxu3 %v27_v7 }
  0x11   :  { %42 = vmatpush.msra.mxu0 %v27_v7  ;;  %109 = vmatpush.msra.mxu1 %v27_v7 }
  0x12   :  { %113 = vmatpush.msra.mxu2 %v26_v8  ;;  %114 = vmatpush.msra.mxu3 %v26_v8 }
  0x13   :  { %43 = vmatpush.msra.mxu0 %v26_v8  ;;  %112 = vmatpush.msra.mxu1 %v26_v8 }
  0x14   :  { %116 = vmatpush.msra.mxu2 %v25_v9  ;;  %117 = vmatpush.msra.mxu3 %v25_v9 }
  0x15   :  { %44 = vmatpush.msra.mxu0 %v25_v9  ;;  %115 = vmatpush.msra.mxu1 %v25_v9 }
  0x16   :  { %119 = vmatpush.msra.mxu2 %v24_v10  ;;  %120 = vmatpush.msra.mxu3 %v24_v10 }
  0x17   :  { %45 = vmatpush.msra.mxu0 %v24_v10  ;;  %118 = vmatpush.msra.mxu1 %v24_v10 }
  0x18   :  { %122 = vmatpush.msra.mxu2 %v23_v11  ;;  %123 = vmatpush.msra.mxu3 %v23_v11 }
  0x19   :  { %46 = vmatpush.msra.mxu0 %v23_v11  ;;  %121 = vmatpush.msra.mxu1 %v23_v11 }
  0x1a   :  { %125 = vmatpush.msra.mxu2 %v22_v12  ;;  %126 = vmatpush.msra.mxu3 %v22_v12 }
  0x1b   :  { %47 = vmatpush.msra.mxu0 %v22_v12  ;;  %124 = vmatpush.msra.mxu1 %v22_v12 }
  0x1c   :  { %128 = vmatpush.msra.mxu2 %v21_v13  ;;  %129 = vmatpush.msra.mxu3 %v21_v13 }
  0x1d   :  { %48 = vmatpush.msra.mxu0 %v21_v13  ;;  %127 = vmatpush.msra.mxu1 %v21_v13 }
  0x1e   :  { %131 = vmatpush.msra.mxu2 %v20_v14  ;;  %132 = vmatpush.msra.mxu3 %v20_v14 }
  0x1f   :  { %49 = vmatpush.msra.mxu0 %v20_v14  ;;  %130 = vmatpush.msra.mxu1 %v20_v14 }
  0x20   :  { %134 = vmatpush.msra.mxu2 %v19_v15  ;;  %135 = vmatpush.msra.mxu3 %v19_v15 }
  0x21   :  { %63 = vmatmul.f32.vlgmr.msra.gmra.mxu2 %v15_v16  ;;  %69 = vmatmul.f32.vlgmr.msra.gmra.mxu3 %v17_v17 }
  0x22   :  { %50 = vmatpush.msra.mxu0 %v19_v15  ;;  %133 = vmatpush.msra.mxu1 %v19_v15 }
  0x23   :  { %51 = vmatmul.f32.vlgmr.msra.gmra.mxu0 %v11_v18  ;;  %57 = vmatmul.f32.vlgmr.msra.gmra.mxu1 %v13_v19 }
  0x29   :  { %66 = vmatmul.f32.gmra.mxu2 %v16_v20  ;;  %72 = vmatmul.f32.gmra.mxu3 %v18_v21 }
  0x2b   :  { %54 = vmatmul.f32.gmra.mxu0 %v12_v22  ;;  %60 = vmatmul.f32.gmra.mxu1 %v14_v23 }
  0xa0   :  { %v52_v24 = vpop.f32.mrf.mxu0  ;;  %v58_v25 = vpop.f32.mrf.mxu1 }
  0xa1   :  { %76 = vst [vmem:[%s249_s2] sm:$0xff] %v52_v24 }
  0xa2   :  { %78 = vst [vmem:[%s249_s2 + $0x10] sm:$0xff] %v58_v25 }
  0xa4   :  { %v64_v26 = vpop.f32.mrf.mxu2  ;;  %v70_v27 = vpop.f32.mrf.mxu3 }
  0xa5   :  { %80 = vst [vmem:[%s249_s2 + $0x20] sm:$0xff] %v64_v26 }
  0xa6   :  { %82 = vst [vmem:[%s249_s2 + $0x30] sm:$0xff] %v70_v27 }
  0xa8   :  { %v55_v28 = vpop.f32.mrf.mxu0  ;;  %v61_v29 = vpop.f32.mrf.mxu1 }
  0xa9   :  { %77 = vst [vmem:[%s249_s2 + $0x8] sm:$0xff] %v55_v28 }
  0xaa   :  { %79 = vst [vmem:[%s249_s2 + $0x18] sm:$0xff] %v61_v29 }
  0xac   :  { %v67_v30 = vpop.f32.mrf.mxu2  ;;  %v73_v31 = vpop.f32.mrf.mxu3 }
  0xad   :  { %81 = vst [vmem:[%s249_s2 + $0x28] sm:$0xff] %v67_v30 }
  0xae   :  { %83 = vst [vmem:[%s249_s2 + $0x38] sm:$0xff] %v73_v31 }

// kernel: basic_rnn_rollout.4
= control target key start
LH: loop header
LB: loop body
LE: loop exit
PB: predicated region body
PF: predicated region fallthrough
CT: control target
= control target key end

     0   :  { %s612_s0 = inlined_call_operand.vmem [shape: f32[8,128], index: 0, kind: input, shape index: {}]   ;;  %s613_s1 = inlined_call_operand.vmem [shape: f32[8,8,128], index: 1, kind: input, shape index: {}]   ;;  %s614_s2 = inlined_call_operand.vmem [shape: f32[128,128], index: 2, kind: input, shape index: {}]   ;;  %s615_s3 = inlined_call_operand.vmem [shape: f32[8,8,128], index: 3, kind: output, shape index: {0}]   ;;  %s616_s4 = inlined_call_operand.hbm [shape: f32[8,128], index: 4, kind: output, shape index: {1}]  }
   0x1   :  { %v353_v0 = vld [vmem:[%s614_s2 + $0x78] sm:$0xff]  ;;  %v358_v1 = vld [vmem:[%s614_s2 + $0x70] sm:$0xff]  ;;  %v365_v2 = vld [vmem:[%s614_s2 + $0x68] sm:$0xff] }
   0x2   :  { %41 = vmatpush.msra.mxu0 %v353_v0  ;;  %66 = vmatpush.msra.mxu1 %v353_v0  ;;  %v374_v3 = vld [vmem:[%s614_s2 + $0x60] sm:$0xff]  ;;  %v383_v4 = vld [vmem:[%s614_s2 + $0x58] sm:$0xff] }
   0x3   :  { %92 = vmatpush.msra.mxu2 %v353_v0  ;;  %118 = vmatpush.msra.mxu3 %v353_v0 }
   0x4   :  { %42 = vmatpush.msra.mxu0 %v358_v1  ;;  %67 = vmatpush.msra.mxu1 %v358_v1 }
   0x5   :  { %93 = vmatpush.msra.mxu2 %v358_v1  ;;  %119 = vmatpush.msra.mxu3 %v358_v1 }
   0x6   :  { %43 = vmatpush.msra.mxu0 %v365_v2  ;;  %68 = vmatpush.msra.mxu1 %v365_v2 }
   0x7   :  { %94 = vmatpush.msra.mxu2 %v365_v2  ;;  %120 = vmatpush.msra.mxu3 %v365_v2 }
   0x8   :  { %10 = vsyncpa [#allocation3], 0  ;;  %44 = vmatpush.msra.mxu0 %v374_v3  ;;  %69 = vmatpush.msra.mxu1 %v374_v3  ;;  %v392_v5 = vld [vmem:[%s614_s2 + $0x50] sm:$0xff]  ;;  %v401_v6 = vld [vmem:[%s614_s2 + $0x48] sm:$0xff]  ;;  %s324_s23 = smov [#allocation2]   ;;  %s256_s27 = sshll.u32 %s616_s4, 4  ;;  %s257_s27 = int_to_ptr.hbm [resolvable:$true] %s256_s27 }
   0x9   :  { %95 = vmatpush.msra.mxu2 %v374_v3  ;;  %121 = vmatpush.msra.mxu3 %v374_v3  ;;  %v410_v7 = vld [vmem:[%s614_s2 + $0x40] sm:$0xff]  ;;  %v419_v8 = vld [vmem:[%s614_s2 + $0x38] sm:$0xff]  ;;  %v428_v9 = vld [vmem:[%s614_s2 + $0x30] sm:$0xff]  ;;  %s254_s24 = sshll.u32 %s324_s23, 4  ;;  %s255_s24 = int_to_ptr.vmem [resolvable:$true] %s254_s24 }
   0xa   :  { %45 = vmatpush.msra.mxu0 %v383_v4  ;;  %70 = vmatpush.msra.mxu1 %v383_v4  ;;  %v437_v10 = vld [vmem:[%s614_s2 + $0x28] sm:$0xff]  ;;  %v446_v11 = vld [vmem:[%s614_s2 + $0x20] sm:$0xff]  ;;  %v455_v12 = vld [vmem:[%s614_s2 + $0x18] sm:$0xff] }
   0xb   :  { %96 = vmatpush.msra.mxu2 %v383_v4  ;;  %122 = vmatpush.msra.mxu3 %v383_v4  ;;  %v464_v13 = vld [vmem:[%s614_s2 + $0x10] sm:$0xff]  ;;  %v473_v14 = vld [vmem:[%s614_s2 + $0x8] sm:$0xff]  ;;  %v482_v15 = vld [vmem:[%s614_s2] sm:$0xff] }
   0xc   :  { %46 = vmatpush.msra.mxu0 %v392_v5  ;;  %71 = vmatpush.msra.mxu1 %v392_v5  ;;  %v21_v16 = vld [vmem:[%s612_s0] sm:$0xff]  ;;  %v267_v21 = vld [vmem:[%s613_s1 + $0x8] sm:$0xff]  ;;  %v269_v25 = vld [vmem:[%s613_s1 + $0x10] sm:$0xff] }
   0xd   :  { %97 = vmatpush.msra.mxu2 %v392_v5  ;;  %123 = vmatpush.msra.mxu3 %v392_v5  ;;  %v40_v17 = vld [vmem:[%s613_s1] sm:$0xff]  ;;  %v271_v29 = vld [vmem:[%s613_s1 + $0x18] sm:$0xff]  ;;  %v275_v37 = vld [vmem:[%s613_s1 + $0x28] sm:$0xff] }
   0xe   :  { %47 = vmatpush.msra.mxu0 %v401_v6  ;;  %72 = vmatpush.msra.mxu1 %v401_v6  ;;  %v273_v33 = vld [vmem:[%s613_s1 + $0x20] sm:$0xff]  ;;  %v277_v41 = vld [vmem:[%s613_s1 + $0x30] sm:$0xff]  ;;  %v279_v45 = vld [vmem:[%s613_s1 + $0x38] sm:$0xff] }
   0xf   :  { %98 = vmatpush.msra.mxu2 %v401_v6  ;;  %124 = vmatpush.msra.mxu3 %v401_v6 }
  0x10   :  { %48 = vmatpush.msra.mxu0 %v410_v7  ;;  %73 = vmatpush.msra.mxu1 %v410_v7 }
  0x11   :  { %99 = vmatpush.msra.mxu2 %v410_v7  ;;  %125 = vmatpush.msra.mxu3 %v410_v7 }
  0x12   :  { %49 = vmatpush.msra.mxu0 %v419_v8  ;;  %74 = vmatpush.msra.mxu1 %v419_v8 }
  0x13   :  { %100 = vmatpush.msra.mxu2 %v419_v8  ;;  %126 = vmatpush.msra.mxu3 %v419_v8 }
  0x14   :  { %50 = vmatpush.msra.mxu0 %v428_v9  ;;  %75 = vmatpush.msra.mxu1 %v428_v9 }
  0x15   :  { %101 = vmatpush.msra.mxu2 %v428_v9  ;;  %127 = vmatpush.msra.mxu3 %v428_v9 }
  0x16   :  { %51 = vmatpush.msra.mxu0 %v437_v10  ;;  %76 = vmatpush.msra.mxu1 %v437_v10 }
  0x17   :  { %102 = vmatpush.msra.mxu2 %v437_v10  ;;  %128 = vmatpush.msra.mxu3 %v437_v10 }
  0x18   :  { %52 = vmatpush.msra.mxu0 %v446_v11  ;;  %77 = vmatpush.msra.mxu1 %v446_v11 }
  0x19   :  { %103 = vmatpush.msra.mxu2 %v446_v11  ;;  %129 = vmatpush.msra.mxu3 %v446_v11 }
  0x1a   :  { %53 = vmatpush.msra.mxu0 %v455_v12  ;;  %78 = vmatpush.msra.mxu1 %v455_v12 }
  0x1b   :  { %104 = vmatpush.msra.mxu2 %v455_v12  ;;  %130 = vmatpush.msra.mxu3 %v455_v12 }
  0x1c   :  { %54 = vmatpush.msra.mxu0 %v464_v13  ;;  %79 = vmatpush.msra.mxu1 %v464_v13 }
  0x1d   :  { %105 = vmatpush.msra.mxu2 %v464_v13  ;;  %131 = vmatpush.msra.mxu3 %v464_v13 }
  0x1e   :  { %55 = vmatpush.msra.mxu0 %v473_v14  ;;  %80 = vmatpush.msra.mxu1 %v473_v14 }
  0x1f   :  { %106 = vmatpush.msra.mxu2 %v473_v14  ;;  %132 = vmatpush.msra.mxu3 %v473_v14 }
  0x20   :  { %56 = vmatpush.msra.mxu0 %v482_v15  ;;  %81 = vmatpush.msra.mxu1 %v482_v15 }
  0x21   :  { %57 = vmatmul.f32.vlgmr.msra.gmra.mxu0 %v21_v16  ;;  %107 = vmatpush.msra.mxu2 %v482_v15 }
  0x22   :  { %133 = vmatpush.msra.mxu3 %v482_v15  ;;  %144 = vmatpush.msrb.mxu0 %v353_v0 }
  0x23   :  { %170 = vmatpush.msrb.mxu1 %v353_v0  ;;  %196 = vmatpush.msrb.mxu2 %v353_v0 }
  0x24   :  { %145 = vmatpush.msrb.mxu0 %v358_v1  ;;  %222 = vmatpush.msrb.mxu3 %v353_v0 }
  0x25   :  { %171 = vmatpush.msrb.mxu1 %v358_v1  ;;  %197 = vmatpush.msrb.mxu2 %v358_v1 }
  0x26   :  { %146 = vmatpush.msrb.mxu0 %v365_v2  ;;  %223 = vmatpush.msrb.mxu3 %v358_v1 }
  0x27   :  { %172 = vmatpush.msrb.mxu1 %v365_v2  ;;  %198 = vmatpush.msrb.mxu2 %v365_v2 }
  0x28   :  { %147 = vmatpush.msrb.mxu0 %v374_v3  ;;  %224 = vmatpush.msrb.mxu3 %v365_v2 }
  0x29   :  { %173 = vmatpush.msrb.mxu1 %v374_v3  ;;  %199 = vmatpush.msrb.mxu2 %v374_v3 }
  0x2a   :  { %148 = vmatpush.msrb.mxu0 %v383_v4  ;;  %225 = vmatpush.msrb.mxu3 %v374_v3 }
  0x2b   :  { %174 = vmatpush.msrb.mxu1 %v383_v4  ;;  %200 = vmatpush.msrb.mxu2 %v383_v4 }
  0x2c   :  { %149 = vmatpush.msrb.mxu0 %v392_v5  ;;  %226 = vmatpush.msrb.mxu3 %v383_v4 }
  0x2d   :  { %175 = vmatpush.msrb.mxu1 %v392_v5  ;;  %201 = vmatpush.msrb.mxu2 %v392_v5 }
  0x2e   :  { %150 = vmatpush.msrb.mxu0 %v401_v6  ;;  %227 = vmatpush.msrb.mxu3 %v392_v5 }
  0x2f   :  { %176 = vmatpush.msrb.mxu1 %v401_v6  ;;  %202 = vmatpush.msrb.mxu2 %v401_v6 }
  0x30   :  { %151 = vmatpush.msrb.mxu0 %v410_v7  ;;  %228 = vmatpush.msrb.mxu3 %v401_v6 }
  0x31   :  { %177 = vmatpush.msrb.mxu1 %v410_v7  ;;  %203 = vmatpush.msrb.mxu2 %v410_v7 }
  0x32   :  { %152 = vmatpush.msrb.mxu0 %v419_v8  ;;  %229 = vmatpush.msrb.mxu3 %v410_v7 }
  0x33   :  { %178 = vmatpush.msrb.mxu1 %v419_v8  ;;  %204 = vmatpush.msrb.mxu2 %v419_v8 }
  0x34   :  { %153 = vmatpush.msrb.mxu0 %v428_v9  ;;  %230 = vmatpush.msrb.mxu3 %v419_v8 }
  0x35   :  { %179 = vmatpush.msrb.mxu1 %v428_v9  ;;  %205 = vmatpush.msrb.mxu2 %v428_v9 }
  0x36   :  { %154 = vmatpush.msrb.mxu0 %v437_v10  ;;  %231 = vmatpush.msrb.mxu3 %v428_v9 }
  0x37   :  { %180 = vmatpush.msrb.mxu1 %v437_v10  ;;  %206 = vmatpush.msrb.mxu2 %v437_v10 }
  0x38   :  { %155 = vmatpush.msrb.mxu0 %v446_v11  ;;  %232 = vmatpush.msrb.mxu3 %v437_v10 }
  0x39   :  { %181 = vmatpush.msrb.mxu1 %v446_v11  ;;  %207 = vmatpush.msrb.mxu2 %v446_v11 }
  0x3a   :  { %156 = vmatpush.msrb.mxu0 %v455_v12  ;;  %233 = vmatpush.msrb.mxu3 %v446_v11 }
  0x3b   :  { %182 = vmatpush.msrb.mxu1 %v455_v12  ;;  %208 = vmatpush.msrb.mxu2 %v455_v12 }
  0x3c   :  { %157 = vmatpush.msrb.mxu0 %v464_v13  ;;  %234 = vmatpush.msrb.mxu3 %v455_v12 }
  0x3d   :  { %183 = vmatpush.msrb.mxu1 %v464_v13  ;;  %209 = vmatpush.msrb.mxu2 %v464_v13 }
  0x3e   :  { %158 = vmatpush.msrb.mxu0 %v473_v14  ;;  %235 = vmatpush.msrb.mxu3 %v464_v13 }
  0x3f   :  { %184 = vmatpush.msrb.mxu1 %v473_v14  ;;  %210 = vmatpush.msrb.mxu2 %v473_v14 }
  0x40   :  { %159 = vmatpush.msrb.mxu0 %v482_v15  ;;  %236 = vmatpush.msrb.mxu3 %v473_v14 }
  0x41   :  { %185 = vmatpush.msrb.mxu1 %v482_v15  ;;  %211 = vmatpush.msrb.mxu2 %v482_v15 }
  0x42   :  { %237 = vmatpush.msrb.mxu3 %v482_v15 }
  0x9e   :  { %v58_v18 = vpop.f32.mrf.mxu0 }
  0x9f   :  { %v61_v19 = vadd.f32 %v58_v18, %v40_v17 }
  0xa1   :  { %282 = vtanh.f32 %v61_v19 }
  0xa7   :  { %v283_v20 = vpop.eup %282 }
  0xa8   :  { %63 = vst [vmem:[%s615_s3] sm:$0xff] %v283_v20  ;;  %82 = vmatmul.f32.vlgmr.msra.gmra.mxu1 %v283_v20 }
 0x125   :  { %v83_v22 = vpop.f32.mrf.mxu1 }
 0x126   :  { %v86_v23 = vadd.f32 %v267_v21, %v83_v22 }
 0x128   :  { %284 = vtanh.f32 %v86_v23 }
 0x12e   :  { %v285_v24 = vpop.eup %284 }
 0x12f   :  { %268 = vst [vmem:[%s615_s3 + $0x8] sm:$0xff] %v285_v24  ;;  %108 = vmatmul.f32.vlgmr.msra.gmra.mxu2 %v285_v24 }
 0x1b2   :  { %v109_v26 = vpop.f32.mrf.mxu2 }
 0x1b3   :  { %v112_v27 = vadd.f32 %v269_v25, %v109_v26 }
 0x1b5   :  { %286 = vtanh.f32 %v112_v27 }
 0x1bb   :  { %v287_v28 = vpop.eup %286 }
 0x1bc   :  { %270 = vst [vmem:[%s615_s3 + $0x10] sm:$0xff] %v287_v28  ;;  %134 = vmatmul.f32.vlgmr.msra.gmra.mxu3 %v287_v28 }
 0x23f   :  { %v135_v30 = vpop.f32.mrf.mxu3 }
 0x240   :  { %v138_v31 = vadd.f32 %v271_v29, %v135_v30 }
 0x242   :  { %288 = vtanh.f32 %v138_v31 }
 0x248   :  { %v289_v32 = vpop.eup %288 }
 0x249   :  { %272 = vst [vmem:[%s615_s3 + $0x18] sm:$0xff] %v289_v32  ;;  %160 = vmatmul.f32.vlgmr.msrb.gmra.mxu0 %v289_v32 }
 0x2c6   :  { %v161_v34 = vpop.f32.mrf.mxu0 }
 0x2c7   :  { %v164_v35 = vadd.f32 %v273_v33, %v161_v34 }
 0x2c9   :  { %290 = vtanh.f32 %v164_v35 }
 0x2cf   :  { %v291_v36 = vpop.eup %290 }
 0x2d0   :  { %274 = vst [vmem:[%s615_s3 + $0x20] sm:$0xff] %v291_v36  ;;  %186 = vmatmul.f32.vlgmr.msrb.gmra.mxu1 %v291_v36 }
 0x34d   :  { %v187_v38 = vpop.f32.mrf.mxu1 }
 0x34e   :  { %v190_v39 = vadd.f32 %v275_v37, %v187_v38 }
 0x350   :  { %292 = vtanh.f32 %v190_v39 }
 0x356   :  { %v293_v40 = vpop.eup %292 }
 0x357   :  { %276 = vst [vmem:[%s615_s3 + $0x28] sm:$0xff] %v293_v40  ;;  %212 = vmatmul.f32.vlgmr.msrb.gmra.mxu2 %v293_v40 }
 0x3da   :  { %v213_v42 = vpop.f32.mrf.mxu2 }
 0x3db   :  { %v216_v43 = vadd.f32 %v277_v41, %v213_v42 }
 0x3dd   :  { %294 = vtanh.f32 %v216_v43 }
 0x3e3   :  { %v295_v44 = vpop.eup %294 }
 0x3e4   :  { %278 = vst [vmem:[%s615_s3 + $0x30] sm:$0xff] %v295_v44  ;;  %238 = vmatmul.f32.vlgmr.msrb.gmra.mxu3 %v295_v44 }
 0x467   :  { %v239_v46 = vpop.f32.mrf.mxu3 }
 0x468   :  { %v242_v47 = vadd.f32 %v279_v45, %v239_v46 }
 0x46a   :  { %296 = vtanh.f32 %v242_v47 }
 0x470   :  { %v297_v48 = vpop.eup %296 }
 0x471   :  { %280 = vst [vmem:[%s615_s3 + $0x38] sm:$0xff] %v297_v48 }
 0x472   :  { %246 = vst [vmem:[#allocation2] sm:$0xff] %v297_v48 }
 0x473   :  { %259 = dma.vmem_to_hbm [thread:$0]  %s255_s24, 128, %s257_s27, [#allocation3]  }
 0x474   :  { %322 = dma.done.wait [#allocation3], 128  }
 0x475   :  { %323 = vsyncadd [#allocation3], 4294967168 }
 0x476   :  { %266 = vsyncpa [#allocation3], 1 }

// kernel: basic_rnn_rollout.5
= control target key start
LH: loop header
LB: loop body
LE: loop exit
PB: predicated region body
PF: predicated region fallthrough
CT: control target
= control target key end

     0   :  { %s273_s0 = inlined_call_operand.vmem [shape: f32[64,128], index: 0, kind: input, shape index: {}]   ;;  %s274_s1 = inlined_call_operand.vmem [shape: f32[128,128], index: 1, kind: input, shape index: {}]   ;;  %s275_s2 = inlined_call_operand.hbm [shape: f32[64,128], index: 2, kind: output, shape index: {}]  }
   0x1   :  { %v35_v0 = vld [vmem:[%s274_s1 + $0x78] sm:$0xff]  ;;  %v34_v1 = vld [vmem:[%s274_s1 + $0x70] sm:$0xff]  ;;  %v33_v2 = vld [vmem:[%s274_s1 + $0x68] sm:$0xff] }
   0x2   :  { %104 = vmatpush.msra.mxu2 %v35_v0  ;;  %105 = vmatpush.msra.mxu3 %v35_v0  ;;  %v32_v3 = vld [vmem:[%s274_s1 + $0x60] sm:$0xff]  ;;  %v31_v4 = vld [vmem:[%s274_s1 + $0x58] sm:$0xff] }
   0x3   :  { %36 = vmatpush.msra.mxu0 %v35_v0  ;;  %103 = vmatpush.msra.mxu1 %v35_v0 }
   0x4   :  { %107 = vmatpush.msra.mxu2 %v34_v1  ;;  %108 = vmatpush.msra.mxu3 %v34_v1 }
   0x5   :  { %37 = vmatpush.msra.mxu0 %v34_v1  ;;  %106 = vmatpush.msra.mxu1 %v34_v1 }
   0x6   :  { %110 = vmatpush.msra.mxu2 %v33_v2  ;;  %111 = vmatpush.msra.mxu3 %v33_v2 }
   0x7   :  { %38 = vmatpush.msra.mxu0 %v33_v2  ;;  %109 = vmatpush.msra.mxu1 %v33_v2 }
   0x8   :  { %113 = vmatpush.msra.mxu2 %v32_v3  ;;  %114 = vmatpush.msra.mxu3 %v32_v3 }
   0x9   :  { %7 = vsyncpa [#allocation3], 0  ;;  %v30_v5 = vld [vmem:[%s274_s1 + $0x50] sm:$0xff]  ;;  %39 = vmatpush.msra.mxu0 %v32_v3  ;;  %112 = vmatpush.msra.mxu1 %v32_v3  ;;  %v29_v6 = vld [vmem:[%s274_s1 + $0x48] sm:$0xff]  ;;  %s180_s28 = smov [#allocation2]   ;;  %s181_s4 = smov 128  }
   0xa   :  { %116 = vmatpush.msra.mxu2 %v31_v4  ;;  %117 = vmatpush.msra.mxu3 %v31_v4  ;;  %v28_v7 = vld [vmem:[%s274_s1 + $0x40] sm:$0xff]  ;;  %v27_v8 = vld [vmem:[%s274_s1 + $0x38] sm:$0xff]  ;;  %v26_v9 = vld [vmem:[%s274_s1 + $0x30] sm:$0xff]  ;;  %s89_s29 = sshll.u32 %s180_s28, 4  ;;  %s182_s5 = smov 8   ;;  %s90_s29 = int_to_ptr.vmem [resolvable:$true] %s89_s29 }
   0xb   :  { %40 = vmatpush.msra.mxu0 %v31_v4  ;;  %115 = vmatpush.msra.mxu1 %v31_v4  ;;  %v25_v10 = vld [vmem:[%s274_s1 + $0x28] sm:$0xff]  ;;  %v24_v11 = vld [vmem:[%s274_s1 + $0x20] sm:$0xff]  ;;  %v23_v12 = vld [vmem:[%s274_s1 + $0x18] sm:$0xff] }
   0xc   :  { %119 = vmatpush.msra.mxu2 %v30_v5  ;;  %120 = vmatpush.msra.mxu3 %v30_v5  ;;  %v22_v13 = vld [vmem:[%s274_s1 + $0x10] sm:$0xff]  ;;  %v21_v14 = vld [vmem:[%s274_s1 + $0x8] sm:$0xff]  ;;  %v20_v15 = vld [vmem:[%s274_s1] sm:$0xff] }
   0xd   :  { %41 = vmatpush.msra.mxu0 %v30_v5  ;;  %118 = vmatpush.msra.mxu1 %v30_v5  ;;  %v16_v16 = vld [vmem:[%s273_s0 + $0x20] sm:$0xff]  ;;  %v18_v17 = vld [vmem:[%s273_s0 + $0x30] sm:$0xff]  ;;  %v17_v20 = vld [vmem:[%s273_s0 + $0x28] sm:$0xff] }
   0xe   :  { %122 = vmatpush.msra.mxu2 %v29_v6  ;;  %123 = vmatpush.msra.mxu3 %v29_v6  ;;  %v12_v18 = vld [vmem:[%s273_s0] sm:$0xff]  ;;  %v14_v19 = vld [vmem:[%s273_s0 + $0x10] sm:$0xff]  ;;  %v19_v21 = vld [vmem:[%s273_s0 + $0x38] sm:$0xff] }
   0xf   :  { %42 = vmatpush.msra.mxu0 %v29_v6  ;;  %121 = vmatpush.msra.mxu1 %v29_v6  ;;  %v13_v22 = vld [vmem:[%s273_s0 + $0x8] sm:$0xff]  ;;  %v15_v23 = vld [vmem:[%s273_s0 + $0x18] sm:$0xff]  ;;  %s91_s0 = sshll.u32 %s275_s2, 4  ;;  %s92_s0 = int_to_ptr.hbm [resolvable:$true] %s91_s0 }
  0x10   :  { %125 = vmatpush.msra.mxu2 %v28_v7  ;;  %126 = vmatpush.msra.mxu3 %v28_v7 }
  0x11   :  { %43 = vmatpush.msra.mxu0 %v28_v7  ;;  %124 = vmatpush.msra.mxu1 %v28_v7 }
  0x12   :  { %128 = vmatpush.msra.mxu2 %v27_v8  ;;  %129 = vmatpush.msra.mxu3 %v27_v8 }
  0x13   :  { %44 = vmatpush.msra.mxu0 %v27_v8  ;;  %127 = vmatpush.msra.mxu1 %v27_v8 }
  0x14   :  { %131 = vmatpush.msra.mxu2 %v26_v9  ;;  %132 = vmatpush.msra.mxu3 %v26_v9 }
  0x15   :  { %45 = vmatpush.msra.mxu0 %v26_v9  ;;  %130 = vmatpush.msra.mxu1 %v26_v9 }
  0x16   :  { %134 = vmatpush.msra.mxu2 %v25_v10  ;;  %135 = vmatpush.msra.mxu3 %v25_v10 }
  0x17   :  { %46 = vmatpush.msra.mxu0 %v25_v10  ;;  %133 = vmatpush.msra.mxu1 %v25_v10 }
  0x18   :  { %137 = vmatpush.msra.mxu2 %v24_v11  ;;  %138 = vmatpush.msra.mxu3 %v24_v11 }
  0x19   :  { %47 = vmatpush.msra.mxu0 %v24_v11  ;;  %136 = vmatpush.msra.mxu1 %v24_v11 }
  0x1a   :  { %140 = vmatpush.msra.mxu2 %v23_v12  ;;  %141 = vmatpush.msra.mxu3 %v23_v12 }
  0x1b   :  { %48 = vmatpush.msra.mxu0 %v23_v12  ;;  %139 = vmatpush.msra.mxu1 %v23_v12 }
  0x1c   :  { %143 = vmatpush.msra.mxu2 %v22_v13  ;;  %144 = vmatpush.msra.mxu3 %v22_v13 }
  0x1d   :  { %49 = vmatpush.msra.mxu0 %v22_v13  ;;  %142 = vmatpush.msra.mxu1 %v22_v13 }
  0x1e   :  { %146 = vmatpush.msra.mxu2 %v21_v14  ;;  %147 = vmatpush.msra.mxu3 %v21_v14 }
  0x1f   :  { %50 = vmatpush.msra.mxu0 %v21_v14  ;;  %145 = vmatpush.msra.mxu1 %v21_v14 }
  0x20   :  { %149 = vmatpush.msra.mxu2 %v20_v15  ;;  %150 = vmatpush.msra.mxu3 %v20_v15 }
  0x21   :  { %64 = vmatmul.f32.vlgmr.msra.gmra.mxu2 %v16_v16  ;;  %70 = vmatmul.f32.vlgmr.msra.gmra.mxu3 %v18_v17 }
  0x22   :  { %51 = vmatpush.msra.mxu0 %v20_v15  ;;  %148 = vmatpush.msra.mxu1 %v20_v15 }
  0x23   :  { %52 = vmatmul.f32.vlgmr.msra.gmra.mxu0 %v12_v18  ;;  %58 = vmatmul.f32.vlgmr.msra.gmra.mxu1 %v14_v19 }
  0x29   :  { %67 = vmatmul.f32.gmra.mxu2 %v17_v20  ;;  %73 = vmatmul.f32.gmra.mxu3 %v19_v21 }
  0x2b   :  { %55 = vmatmul.f32.gmra.mxu0 %v13_v22  ;;  %61 = vmatmul.f32.gmra.mxu1 %v15_v23 }
  0xa0   :  { %v53_v24 = vpop.f32.mrf.mxu0  ;;  %v59_v25 = vpop.f32.mrf.mxu1 }
  0xa1   :  { %77 = vst [vmem:[#allocation2] sm:$0xff] %v53_v24 }
  0xa2   :  { %79 = vst [vmem:[#allocation2 + $0x10] sm:$0xff] %v59_v25 }
  0xa4   :  { %v65_v26 = vpop.f32.mrf.mxu2  ;;  %v71_v27 = vpop.f32.mrf.mxu3 }
  0xa5   :  { %81 = vst [vmem:[#allocation2 + $0x20] sm:$0xff] %v65_v26 }
  0xa6   :  { %83 = vst [vmem:[#allocation2 + $0x30] sm:$0xff] %v71_v27 }
  0xa8   :  { %v56_v28 = vpop.f32.mrf.mxu0  ;;  %v62_v29 = vpop.f32.mrf.mxu1 }
  0xa9   :  { %78 = vst [vmem:[#allocation2 + $0x8] sm:$0xff] %v56_v28 }
  0xaa   :  { %80 = vst [vmem:[#allocation2 + $0x18] sm:$0xff] %v62_v29 }
  0xac   :  { %v68_v30 = vpop.f32.mrf.mxu2  ;;  %v74_v31 = vpop.f32.mrf.mxu3 }
  0xad   :  { %82 = vst [vmem:[#allocation2 + $0x28] sm:$0xff] %v68_v30 }
  0xae   :  { %84 = vst [vmem:[#allocation2 + $0x38] sm:$0xff] %v74_v31 }
  0xaf   :  { %97 = dma.vmem_to_hbm [thread:$0]  %s90_s29, 1024, %s92_s0, [#allocation3], %s181_s4, %s181_s4, %s182_s5  }
  0xb0   :  { %178 = dma.done.wait [#allocation3], 1024  }
  0xb1   :  { %179 = vsyncadd [#allocation3], 4294966272 }
  0xb2   :  { %102 = vsyncpa [#allocation3], 1 }

</bundles_post_ra>
